<compile_context>
chip_gen: v7x
topology: tpu7x:2x2x1
jax: 0.10.0
libtpu: 0.0.40
codegen_flags: <defaults>
</compile_context>

<pallas_src>
import jax
import jax.numpy as jnp
from jax.experimental import pallas as pl
from jax.experimental.pallas import tpu as pltpu

K = 3        # conv kernel size
PAD = 1      # 'same' padding for K=3


def resblock_kernel(x_ref, w_ref, shift_ref, o_ref):
    """Fused Conv1d(k=3,'same') + BatchNorm(eval) + ReLU + residual add.

    Native (N, C, L) layout, one batch element per grid step.

      x_ref     : (1, C, L)   input, read once (also used as the residual)
      w_ref     : (C, K*C)    BN-scale-folded conv weights; column block k
                              multiplies x[:, l + k - 1]
      shift_ref : (C, 1)      folded conv bias + BN shift (f32)
      o_ref     : (1, C, L)   output
    """
    x = x_ref[0]                                  # (C, L)
    C, L = x.shape

    # Shifted copies of x along L for the 3-tap 'same' conv, built in-register
    # (XLU lane rotate + iota mask) instead of a wrapper-side jnp.pad.
    col = jax.lax.broadcasted_iota(jnp.int32, (C, L), 1)
    zero = jnp.zeros_like(x)
    x_prev = jnp.where(col == 0, zero, pltpu.roll(x, shift=1, axis=1))          # x[:, l-1]
    x_next = jnp.where(col == L - 1, zero, pltpu.roll(x, shift=L - 1, axis=1))  # x[:, l+1]

    # im2col over the taps along the contraction (sublane) axis: (3C, L).
    xcol = jnp.concatenate([x_prev, x, x_next], axis=0)

    # Single MXU contraction (BN scale already folded into w), f32 accumulate.
    y = jnp.dot(w_ref[...], xcol, preferred_element_type=jnp.float32)  # (C, L)
    y = y + shift_ref[...]                        # folded conv bias + BN shift
    y = jnp.maximum(y, 0.0)                       # ReLU
    o_ref[0] = (x.astype(jnp.float32) + y).astype(o_ref.dtype)  # residual add


def resblock_forward(x_ncl, w_oik, bias, gamma, beta, run_mean, run_var,
                     eps=1e-5, compute_dtype=None):
    """x_ncl: (N, C, L) exactly like the PyTorch module.  Returns (N, C, L)."""
    N, C, L = x_ncl.shape
    out_dtype = x_ncl.dtype if compute_dtype is None else jnp.dtype(compute_dtype)

    # Fold eval-mode BatchNorm + conv bias into the weights / a single shift:
    #   BN(W@x + b) = (scale ⊙_rows W) @ x + (scale*b + beta - mean*scale)
    scale = gamma / jnp.sqrt(run_var + eps)                    # (C,)
    shift = scale * bias + beta - run_mean * scale             # (C,)

    # (C_out, C_in, K) -> (C_out, K*C_in); column block k is tap k, matching
    # the kernel's [x[l-1] | x[l] | x[l+1]] row ordering of the im2col buffer.
    w_cat = jnp.transpose(w_oik, (0, 2, 1)).reshape(C, K * C)
    w_fold = w_cat * scale[:, None]

    if compute_dtype is not None:       # bf16 on v6e/v7x halves HBM bytes
        x_ncl = x_ncl.astype(compute_dtype)
        w_fold = w_fold.astype(compute_dtype)
    shift2d = shift.astype(jnp.float32).reshape(C, 1)

    # Grid: one batch element per step, marked "parallel" so megacore / the
    # two v7x TensorCores can shard it.  Each step reads the input exactly
    # once; the residual comes from the same resident VMEM tile.
    # NOTE: for very long sequences / wide channels (per-element block bytes
    # approaching the v7x 64 MiB VMEM budget) an additional L-tiling grid axis
    # with a 1-column halo (pl.Element-indexed input or a manual halo DMA)
    # should be added to bound per-step VMEM and give the pipeline more steps.
    out = pl.pallas_call(
        resblock_kernel,
        out_shape=jax.ShapeDtypeStruct((N, C, L), out_dtype),
        grid_spec=pltpu.PrefetchScalarGridSpec(
            num_scalar_prefetch=0,
            grid=(N,),
            in_specs=[
                pl.BlockSpec((1, C, L), lambda n: (n, 0, 0)),   # x (single read)
                pl.BlockSpec((C, K * C), lambda n: (0, 0)),     # folded weights
                pl.BlockSpec((C, 1), lambda n: (0, 0)),         # folded shift
            ],
            out_specs=pl.BlockSpec((1, C, L), lambda n: (n, 0, 0)),
        ),
        compiler_params=pltpu.CompilerParams(
            dimension_semantics=("parallel",),
            vmem_limit_bytes=32 * 1024 * 1024,
        ),
    )(x_ncl, w_fold, shift2d)
    return out


def resblock_reference(x_ncl, w_oik, bias, gamma, beta, run_mean, run_var, eps=1e-5):
    """Plain-JAX reference of x + ReLU(BN(Conv1d(x)))."""
    y = jax.lax.conv_general_dilated(
        x_ncl, w_oik,
        window_strides=(1,),
        padding=((PAD, PAD),),
        dimension_numbers=("NCH", "OIH", "NCH"),
    )
    y = y + bias[None, :, None]
    scale = gamma / jnp.sqrt(run_var + eps)
    shift = beta - run_mean * scale
    y = y * scale[None, :, None] + shift[None, :, None]
    y = jnp.maximum(y, 0.0)
    return x_ncl + y


if __name__ == "__main__":
    key = jax.random.PRNGKey(0)
    k_x, k_w, k_b, k_g, k_be, k_m, k_v = jax.random.split(key, 7)

    N, C, L = 2, 32, 16  # small shapes: batch=2, channels=32, seq=16

    x = jax.random.normal(k_x, (N, C, L), dtype=jnp.float32)

    # deterministic parameter init (synthetic; no checkpoint load)
    w = jax.random.normal(k_w, (C, C, K), dtype=jnp.float32) * 0.1   # (C_out, C_in, K)
    b = jax.random.normal(k_b, (C,), dtype=jnp.float32) * 0.1
    gamma = 1.0 + 0.1 * jax.random.normal(k_g, (C,), dtype=jnp.float32)
    beta = 0.1 * jax.random.normal(k_be, (C,), dtype=jnp.float32)
    run_mean = 0.1 * jax.random.normal(k_m, (C,), dtype=jnp.float32)
    run_var = jnp.abs(jax.random.normal(k_v, (C,), dtype=jnp.float32)) + 0.5

    ref = resblock_reference(x, w, b, gamma, beta, run_mean, run_var)

    # f32 path (bit-accurate against the reference up to fold rounding)
    out = resblock_forward(x, w, b, gamma, beta, run_mean, run_var)
    out = jax.block_until_ready(out)
    assert out.shape == (N, C, L) and out.dtype == x.dtype
    assert jnp.allclose(out, ref, atol=1e-4, rtol=1e-4), "f32 mismatch vs reference"

    # bf16 compute path (native MXU dtype on v6e/v7x; f32 accumulation)
    out_bf16 = resblock_forward(x, w, b, gamma, beta, run_mean, run_var,
                                compute_dtype=jnp.bfloat16)
    out_bf16 = jax.block_until_ready(out_bf16)
    assert out_bf16.shape == (N, C, L) and out_bf16.dtype == jnp.bfloat16
    assert jnp.allclose(out_bf16.astype(jnp.float32), ref, atol=5e-2, rtol=5e-2), \
        "bf16 mismatch vs reference"

    print("KERNEL_OK")
</pallas_src>

<mosaic_0001>
module attributes {stable_mosaic.version = 11 : i64} {
  func.func @resblock_kernel(%arg0: i32, %arg1: memref<1x32x16xf32, #tpu.memory_space<vmem>>, %arg2: memref<32x96xf32, #tpu.memory_space<vmem>>, %arg3: memref<32x1xf32, #tpu.memory_space<vmem>>, %arg4: memref<1x32x16xf32, #tpu.memory_space<vmem>>) attributes {dimension_semantics = [#tpu.dimension_semantics<parallel>], iteration_bounds = array<i64: 2>, scalar_prefetch = 0 : i64, scratch_operands = 0 : i64, tpu.core_type = #tpu.core_type<tc>, window_params = [{transform_indices = @transform_0, window_bounds = array<i64: 1, 32, 16>}, {pipeline_mode = #tpu.pipeline_mode<synchronous>, transform_indices = @transform_1, window_bounds = array<i64: 32, 96>}, {pipeline_mode = #tpu.pipeline_mode<synchronous>, transform_indices = @transform_2, window_bounds = array<i64: 32, 1>}, {transform_indices = @transform_3, window_bounds = array<i64: 1, 32, 16>}]} {
    %c0 = arith.constant 0 : index
    %c0_0 = arith.constant 0 : index
    %c0_1 = arith.constant 0 : index
    %0 = vector.load %arg1[%c0, %c0_0, %c0_1] : memref<1x32x16xf32, #tpu.memory_space<vmem>>, vector<1x32x16xf32>
    %1 = vector.shape_cast %0 : vector<1x32x16xf32> to vector<32x16xf32>
    %2 = tpu.iota {dimensions = array<i32: 1>} : vector<32x16xi32>
    %cst = arith.constant 0.000000e+00 : f32
    %3 = vector.broadcast %cst : f32 to vector<32x16xf32>
    %c0_i32 = arith.constant 0 : i32
    %4 = vector.broadcast %c0_i32 : i32 to vector<32x16xi32>
    %5 = arith.cmpi eq, %2, %4 : vector<32x16xi32>
    %c1_i32 = arith.constant 1 : i32
    %6 = tpu.dynamic_rotate %1 by %c1_i32 dim 1 : vector<32x16xf32>, i32 -> vector<32x16xf32>
    %7 = arith.select %5, %3, %6 : vector<32x16xi1>, vector<32x16xf32>
    %c15_i32 = arith.constant 15 : i32
    %8 = vector.broadcast %c15_i32 : i32 to vector<32x16xi32>
    %9 = arith.cmpi eq, %2, %8 : vector<32x16xi32>
    %c15_i32_2 = arith.constant 15 : i32
    %10 = tpu.dynamic_rotate %1 by %c15_i32_2 dim 1 : vector<32x16xf32>, i32 -> vector<32x16xf32>
    %11 = arith.select %9, %3, %10 : vector<32x16xi1>, vector<32x16xf32>
    %12 = tpu.concatenate %7, %1, %11 in 0 : vector<32x16xf32>, vector<32x16xf32>, vector<32x16xf32> -> vector<96x16xf32>
    %c0_3 = arith.constant 0 : index
    %c0_4 = arith.constant 0 : index
    %13 = vector.load %arg2[%c0_3, %c0_4] : memref<32x96xf32, #tpu.memory_space<vmem>>, vector<32x96xf32>
    %cst_5 = arith.constant dense<0.000000e+00> : vector<32x16xf32>
    %14 = tpu.matmul %13, %12, %cst_5 {dimension_numbers = #tpu.dot_dimension_numbers<[1], [0], [0], [1], [0, 0, 1, 1], [], []>} : vector<32x96xf32>, vector<96x16xf32>, vector<32x16xf32> -> vector<32x16xf32>
    %c0_6 = arith.constant 0 : index
    %c0_7 = arith.constant 0 : index
    %15 = vector.load %arg3[%c0_6, %c0_7] : memref<32x1xf32, #tpu.memory_space<vmem>>, vector<32x1xf32>
    %16 = vector.broadcast %15 : vector<32x1xf32> to vector<32x16xf32>
    %17 = arith.addf %14, %16 : vector<32x16xf32>
    %cst_8 = arith.constant 0.000000e+00 : f32
    %18 = vector.broadcast %cst_8 : f32 to vector<32x16xf32>
    %19 = arith.maximumf %17, %18 : vector<32x16xf32>
    %20 = arith.addf %1, %19 : vector<32x16xf32>
    %c0_9 = arith.constant 0 : index
    %c0_10 = arith.constant 0 : index
    %c0_11 = arith.constant 0 : index
    %21 = vector.load %arg4[%c0_9, %c0_10, %c0_11] : memref<1x32x16xf32, #tpu.memory_space<vmem>>, vector<1x32x16xf32>
    %22 = vector.shape_cast %21 : vector<1x32x16xf32> to vector<32x16xf32>
    %23 = vector.shape_cast %20 : vector<32x16xf32> to vector<1x32x16xf32>
    tpu.vector_store %arg4[%c0_9, %c0_10, %c0_11], %23 {strides = array<i32>} : memref<1x32x16xf32, #tpu.memory_space<vmem>>, vector<1x32x16xf32>,
    return
  }
  func.func @transform_0(%arg0: i32) -> (i32, i32, i32) {
    %c0_i32 = arith.constant 0 : i32
    %c0_i32_0 = arith.constant 0 : i32
    %c0_i32_1 = arith.constant 0 : i32
    return %arg0, %c0_i32, %c0_i32_0 : i32, i32, i32
  }
  func.func @transform_1(%arg0: i32) -> (i32, i32) {
    %c0_i32 = arith.constant 0 : i32
    %c0_i32_0 = arith.constant 0 : i32
    %c0_i32_1 = arith.constant 0 : i32
    return %c0_i32, %c0_i32_0 : i32, i32
  }
  func.func @transform_2(%arg0: i32) -> (i32, i32) {
    %c0_i32 = arith.constant 0 : i32
    %c0_i32_0 = arith.constant 0 : i32
    %c0_i32_1 = arith.constant 0 : i32
    return %c0_i32, %c0_i32_0 : i32, i32
  }
  func.func @transform_3(%arg0: i32) -> (i32, i32, i32) {
    %c0_i32 = arith.constant 0 : i32
    %c0_i32_0 = arith.constant 0 : i32
    %c0_i32_1 = arith.constant 0 : i32
    return %arg0, %c0_i32, %c0_i32_0 : i32, i32, i32
  }
}

</mosaic_0001>

<bundles_post_ra>
// kernel: tpu_custom_call.1
= control target key start
LH: loop header
LB: loop body
LE: loop exit
PB: predicated region body
PF: predicated region fallthrough
CT: control target
= control target key end

     0   :  { %s645_s12 = smov 0   ;;  %s733_s0 = inlined_call_operand.vmem [shape: f32[2,32,16], index: 0, kind: input, shape index: {}]   ;;  %s734_s1 = inlined_call_operand.vmem [shape: f32[32,96], index: 1, kind: input, shape index: {}]   ;;  %s735_s2 = inlined_call_operand.vmem [shape: f32[32,1], index: 2, kind: input, shape index: {}]   ;;  %s736_s3 = inlined_call_operand.vmem [shape: f32[2,32,16], index: 3, kind: output, shape index: {}]  }
   0x1 LB: > { %s434_s13 = sadd.s32 4294967295, %s619_s12   ;;  %p438_p0 = scmp.ge.s32.totalorder %s619_s12, 1  ;;  %s619_s12 = sphi %s645_s12, %s13_s12  }
   0x2   : > { %p137_p1 = scmp.lt.s32.totalorder %s619_s12, 3 }
   0x4   : > { %p138_p2 = pnand %p438_p0, %p137_p1 }
   0x5   : > { %p161_p3 = scmp.lt.s32.totalorder (!%p138_p2), %s434_s13, 1  ;;  %s621_s18 = smov (!%p138_p2), 16   ;;  %vm178_vm0 = vcmask (!%p138_p2), 1047680   ;;  %v240_v30 = vld [vmem:[%s734_s1] sm:$0xff] (!%p138_p2)  ;;  %vm268_vm1 = vcmask (!%p138_p2), 785408   ;;  %v242_v31 = vld [vmem:[%s734_s1 + $0x10] sm:$0xff] (!%p138_p2)  ;;  %v175_v37 = vlaneseq (!%p138_p2) }
   0x6   : > { %141 = sbr.rel (%p138_p2) target bundleno = 622 (0x26e), region = 32  ;;  %s622_s19 = smov (!%p138_p2), 113   ;;  %509 = vmatprep.mubr.msk.f32.mxu0 (!%p138_p2), %vm268_vm1, %v240_v30  ;;  %512 = vmatprep.mubr.msk.f32.mxu1 (!%p138_p2), %vm268_vm1, %v242_v31  ;;  %v245_v32 = vld [vmem:[%s735_s2 + $0x8] sm:$0xff] (!%p138_p2)  ;;  %v244_v33 = vld [vmem:[%s735_s2] sm:$0xff] (!%p138_p2)  ;;  %v624_v34 = vmov (!%p138_p2), 0   ;;  %v246_v35 = vld [vmem:[%s735_s2 + $0x10] sm:$0xff] (!%p138_p2) }
   0x7   : > { %s623_s20 = smov (!%p138_p2), 127   ;;  %612 = vset.pattern.permute.xlu1 (!%p138_p2), %v624_v34  ;;  %611 = vset.pattern.permute.xlu0 (!%p138_p2), %v624_v34  ;;  %v247_v36 = vld [vmem:[%s735_s2 + $0x18] sm:$0xff] (!%p138_p2)  ;;  %v176_v38 = vand.u32 (!%p138_p2), 127, %v175_v37  ;;  %v241_v57 = vld [vmem:[%s734_s1 + $0x8] sm:$0xff] (!%p138_p2)  ;;  %vm374_vm6 = vcmask (!%p138_p2), 130048  }
   0x8   : > { %v243_v58 = vld [vmem:[%s734_s1 + $0x18] sm:$0xff] (!%p138_p2) }
   0x9   : > { %vm467_vm2 = vcmp.ne.s32.totalorder (!%p138_p2), %v176_v38, 0  ;;  %vm468_vm4 = vcmp.ne.s32.totalorder (!%p138_p2), %v176_v38, 15 }
   0xa   : > { %vm516_vm3 = vmpackc.low (!%p138_p2), %vm467_vm2, %vm467_vm2 }
   0xb   : > { %vm536_vm5 = vmpackc.low (!%p138_p2), %vm468_vm4, %vm468_vm4 }
   0xd   : > { %s738_s13 = smov (!%p161_p3, %s434_s13), 1 }
   0xe   : > { %s465_s14 = sshll.u32 %s738_s13, 5 }
   0xf   : > { %s165_s17 = scalar_lea.vmem %s733_s0, %s465_s14  ;;  %s170_s15 = scalar_lea.vmem %s736_s3, %s465_s14 }
  0x10   : > { %v661_v0 = vld [vmem:[%s165_s17] sm:$0xff]  ;;  %v663_v1 = vld [vmem:[%s165_s17 + $0x8] sm:$0xff]  ;;  %v665_v2 = vld [vmem:[%s165_s17 + $0x10] sm:$0xff] }
  0x11   : > { %v571_v3 = vpack.i.bf16 %v663_v1, %v661_v0  ;;  %v669_v4 = vld [vmem:[%s165_s17 + $0x18] sm:$0xff]  ;;  %v527_v47 = vpack.c.bf16 %v663_v1, %v661_v0 }
  0x12   : > { %v576_v5 = vpack.i.bf16 %v669_v4, %v665_v2  ;;  %v531_v49 = vpack.c.bf16 %v669_v4, %v665_v2 }
  0x13   : > { %572 = vrot.lane.b32.xlu0 %v571_v3, %s621_s18 }
  0x17   : > { %577 = vrot.lane.b32.xlu0 %v576_v5, %s621_s18 }
  0x85   : > { %v573_v6 = vpop.permute.xlu0 %572 }
  0x86   : > { %v575_v7 = vunpack.i.h.bf16 %v573_v6  ;;  %v574_v8 = vunpack.i.l.bf16 %v573_v6 }
  0x88   : > { %v181_v9 = vsel %vm178_vm0, %v574_v8, %v661_v0  ;;  %v184_v10 = vsel %vm178_vm0, %v575_v7, %v663_v1 }
  0x89   : > { %v578_v11 = vpop.permute.xlu0 %577  ;;  %v581_v12 = vpack.i.bf16 %v184_v10, %v181_v9 }
  0x8a   : > { %v580_v13 = vunpack.i.h.bf16 %v578_v11  ;;  %v579_v14 = vunpack.i.l.bf16 %v578_v11 }
  0x8b   : > { %582 = vrot.lane.b32.xlu1 %v581_v12, %s621_s18 }
  0x8c   : > { %v187_v15 = vsel %vm178_vm0, %v579_v14, %v665_v2  ;;  %v190_v16 = vsel %vm178_vm0, %v580_v13, %v669_v4 }
  0x8d   : > { %v586_v17 = vpack.i.bf16 %v190_v16, %v187_v15 }
  0x8f   : > { %587 = vrot.lane.b32.xlu1 %v586_v17, %s621_s18 }
  0xfd   : > { %v583_v18 = vpop.permute.xlu1 %582 }
  0xfe   : > { %v585_v19 = vunpack.i.h.bf16 %v583_v18  ;;  %v584_v20 = vunpack.i.l.bf16 %v583_v18 }
 0x100   : > { %v199_v21 = vsel %vm178_vm0, %v584_v20, %v661_v0  ;;  %v200_v22 = vsel %vm178_vm0, %v585_v19, %v663_v1 }
 0x101   : > { %v588_v23 = vpop.permute.xlu1 %587  ;;  %v591_v24 = vpack.i.bf16 %v200_v22, %v199_v21 }
 0x102   : > { %v590_v25 = vunpack.i.h.bf16 %v588_v23  ;;  %v589_v26 = vunpack.i.l.bf16 %v588_v23 }
 0x103   : > { %592 = vrot.lane.b32.xlu0 %v591_v24, %s622_s19 }
 0x104   : > { %v201_v27 = vsel %vm178_vm0, %v589_v26, %v665_v2  ;;  %v202_v28 = vsel %vm178_vm0, %v590_v25, %v669_v4 }
 0x105   : > { %v596_v29 = vpack.i.bf16 %v202_v28, %v201_v27 }
 0x107   : > { %597 = vrot.lane.b32.xlu1 %v596_v29, %s622_s19  ;;  %602 = vrot.lane.b32.xlu0 %v591_v24, %s623_s20 }
 0x10b   : > { %607 = vrot.lane.b32.xlu1 %v596_v29, %s623_s20  ;;  %250 = vperm.xlu0 %611, %v244_v33  }
 0x10f   : > { %255 = vperm.xlu1 %612, %v245_v32   ;;  %265 = vperm.xlu0 %611, %v247_v36  }
 0x113   : > { %260 = vperm.xlu1 %612, %v246_v35  }
 0x175   : > { %v593_v39 = vpop.permute.xlu0 %592 }
 0x176   : > { %v595_v40 = vunpack.i.h.bf16 %v593_v39  ;;  %v594_v41 = vunpack.i.l.bf16 %v593_v39 }
 0x178   : > { %v515_v42 = vpack.c.bf16 %v595_v40, %v594_v41 }
 0x179   : > { %v598_v43 = vpop.permute.xlu1 %597  ;;  %v603_v48 = vpop.permute.xlu0 %602 }
 0x17a   : > { %v600_v44 = vunpack.i.h.bf16 %v598_v43  ;;  %v599_v45 = vunpack.i.l.bf16 %v598_v43  ;;  %517 = vmatprep.subr.msk.bf16.mxu0 %vm516_vm3, %v515_v42  ;;  %547 = vmatprep.subr.msk.bf16.mxu1 %vm516_vm3, %v515_v42  ;;  %v605_v50 = vunpack.i.h.bf16 %v603_v48  ;;  %v604_v51 = vunpack.i.l.bf16 %v603_v48 }
 0x17b   : > { %520 = vmatpush3.bf16.msk.msra.mxu0 %vm516_vm3, %v515_v42  ;;  %553 = vmatpush3.bf16.msk.msra.mxu1 %vm516_vm3, %v515_v42 }
 0x17c   : > { %v521_v46 = vpack.c.bf16 %v600_v44, %v599_v45  ;;  %v535_v53 = vpack.c.bf16 %v605_v50, %v604_v51 }
 0x17d   : > { %v608_v52 = vpop.permute.xlu1 %607 }
 0x17e   : > { %523 = vmatprep.subr.msk.bf16.mxu0 %vm516_vm3, %v521_v46  ;;  %548 = vmatprep.subr.msk.bf16.mxu1 %vm516_vm3, %v521_v46  ;;  %v610_v54 = vunpack.i.h.bf16 %v608_v52  ;;  %v609_v55 = vunpack.i.l.bf16 %v608_v52 }
 0x17f   : > { %526 = vmatpush3.bf16.msk.msra.mxu0 %vm516_vm3, %v521_v46  ;;  %554 = vmatpush3.bf16.msk.msra.mxu1 %vm516_vm3, %v521_v46 }
 0x180   : > { %528 = vmatprep.subr.bf16.mxu0 %v527_v47  ;;  %549 = vmatprep.subr.bf16.mxu1 %v527_v47  ;;  %v541_v56 = vpack.c.bf16 %v610_v54, %v609_v55 }
 0x183   : > { %530 = vmatpush3.bf16.msra.mxu0 %v527_v47  ;;  %555 = vmatpush3.bf16.msra.mxu1 %v527_v47 }
 0x184   : > { %532 = vmatprep.subr.bf16.mxu0 %v531_v49  ;;  %550 = vmatprep.subr.bf16.mxu1 %v531_v49 }
 0x187   : > { %534 = vmatpush3.bf16.msra.mxu0 %v531_v49  ;;  %556 = vmatpush3.bf16.msra.mxu1 %v531_v49 }
 0x188   : > { %537 = vmatprep.subr.msk.bf16.mxu0 %vm536_vm5, %v535_v53  ;;  %551 = vmatprep.subr.msk.bf16.mxu1 %vm536_vm5, %v535_v53 }
 0x18a   : > { %v251_v60 = vpop.permute.xlu0 %250 }
 0x18b   : > { %540 = vmatpush3.bf16.msk.msra.mxu0 %vm536_vm5, %v535_v53  ;;  %557 = vmatpush3.bf16.msk.msra.mxu1 %vm536_vm5, %v535_v53 }
 0x18c   : > { %543 = vmatprep.subr.msk.bf16.mxu0 %vm536_vm5, %v541_v56  ;;  %552 = vmatprep.subr.msk.bf16.mxu1 %vm536_vm5, %v541_v56 }
 0x18e   : > { %v256_v59 = vpop.permute.xlu1 %255  ;;  %v266_v62 = vpop.permute.xlu0 %265 }
 0x18f   : > { %546 = vmatpush3.bf16.msk.msra.mxu0 %vm536_vm5, %v541_v56  ;;  %558 = vmatpush3.bf16.msk.msra.mxu1 %vm536_vm5, %v541_v56 }
 0x192   : > { %510 = vmatmul.mubr.msk.f32.vlgmr.msra.gmra.mrb[0].mxu0 %vm268_vm1, %v241_v57  ;;  %513 = vmatmul.mubr.msk.f32.vlgmr.msra.gmra.mrb[0].mxu1 %vm268_vm1, %v243_v58  ;;  %v261_v61 = vpop.permute.xlu1 %260 }
 0x265   : > { %v511_v63 = vpop.f32.mrb[0].mxu0  ;;  %v514_v3 = vpop.f32.mrb[0].mxu1 }
 0x266   : > { %v353_v5 = vadd.f32 %v511_v63, %v256_v59  ;;  %v363_v6 = vadd.f32 %v514_v3, %v266_v62  ;;  %v347_v7 = vpop.f32.mrb[1].mxu0  ;;  %v357_v8 = vpop.f32.mrb[1].mxu1 }
 0x267   : > { %v348_v9 = vadd.f32 %v347_v7, %v251_v60  ;;  %v358_v10 = vadd.f32 %v357_v8, %v261_v61 }
 0x268   : > { %v367_v11 = vmax.f32 %v353_v5, 0.0  ;;  %v369_v12 = vmax.f32 %v363_v6, 0.0 }
 0x269   : > { %v366_v13 = vmax.f32 %v348_v9, 0.0  ;;  %v368_v14 = vmax.f32 %v358_v10, 0.0 }
 0x26a   : > { %v371_v15 = vadd.f32 %v367_v11, %v663_v1  ;;  %v373_v16 = vadd.f32 %v369_v12, %v669_v4 }
 0x26b   : > { %v370_v17 = vadd.f32 %v366_v13, %v661_v0  ;;  %v372_v18 = vadd.f32 %v368_v14, %v665_v2 }
 0x26c   : > { %376 = vst.msk [vmem:[%s170_s15 + $0x8] sm:$0xff] %vm374_vm6, %v371_v15  ;;  %378 = vst.msk [vmem:[%s170_s15 + $0x18] sm:$0xff] %vm374_vm6, %v373_v16 }
 0x26d   : > { %375 = vst.msk [vmem:[%s170_s15] sm:$0xff] %vm374_vm6, %v370_v17  ;;  %377 = vst.msk [vmem:[%s170_s15 + $0x10] sm:$0xff] %vm374_vm6, %v372_v18 }
 0x26e PF: > { %s13_s12 = sadd.s32 1, %s619_s12  }
 0x26f   : > { %p10_p4 = scmp.ge.s32.totalorder %s13_s12, 4  }
 0x271   :  { %12 = sbr.rel (!%p10_p4) target bundleno = 1 (0x1), region = 62 }

</bundles_post_ra>
